<compile_context>
chip_gen: v7x
topology: tpu7x:2x2x1
jax: 0.10.0
libtpu: 0.0.40
codegen_flags: <defaults>
</compile_context>

<pallas_src>
import math
from functools import partial

import jax
import jax.numpy as jnp
from jax.experimental import pallas as pl
from jax.experimental.pallas import tpu as pltpu

_LANE = 128


# --------------------------------------------------------------------------
# helpers
# --------------------------------------------------------------------------
def _cdiv(a, b):
    return -(-a // b)


def _resolve_shape(shape, numel):
    """Resolve a single -1 in `shape` the same way torch.Tensor.view does."""
    shape = tuple(int(s) for s in shape)
    if -1 in shape:
        idx = shape.index(-1)
        known = 1
        for i, s in enumerate(shape):
            if i != idx:
                known *= s
        assert known != 0 and numel % known == 0, "invalid view shape"
        shape = shape[:idx] + (numel // known,) + shape[idx + 1:]
    assert math.prod(shape) == numel, "view shape must preserve numel"
    return shape


def _sublane_granule(itemsize):
    # Packed-vreg height: f32 -> 8 sublanes, bf16 -> 16, int8/fp8 -> 32.
    return {4: 8, 2: 16, 1: 32}.get(itemsize, 8)


def _copy_params():
    """(target_tile_bytes, vmem_limit_bytes_or_None, tensorcores_per_chip)."""
    try:
        kind = jax.devices()[0].device_kind.lower()
    except Exception:
        kind = ""
    if "v7" in kind:
        # v7x: 3.2 TB/s HBM per TC, 64 MiB VMEM, 32 MiB scoped default, 2 TCs.
        # 4 MiB tiles -> 16 MiB in flight (in+out double-buffered).
        return (4 << 20), (32 << 20), 2
    if "v6" in kind:
        # v6e: ~1.4 TB/s HBM, 32 MiB scoped default.
        return (4 << 20), (32 << 20), 1
    if "v5e" in kind or "v5 lite" in kind or "v5lite" in kind:
        # v5e: ~820 GB/s HBM, 16 MiB scoped default -> 2 MiB tiles (8 MiB in flight).
        return (2 << 20), None, 1
    # Unknown / older chips: conservative, fits a 16 MiB scoped limit.
    return (2 << 20), None, 1


def _plan_slab(numel, itemsize):
    """Pick a lane-dense 2-D slab + tiling for the materializing copy.

    Returns (rows, width, rows_per_tile, vmem_limit) or None when no clean
    tiled layout exists (then the caller uses the whole-array DMA path).
    """
    sublane = _sublane_granule(itemsize)
    tile_bytes, vmem_limit, cores = _copy_params()

    # Preferred: wide lane-dense last dim AND sublane-aligned rows -> every
    # DMA row / vst is unmasked.
    for width in (8192, 4096, 2048, 1024, 512, 256, 128):
        if numel % width != 0:
            continue
        rows = numel // width
        if rows % sublane != 0:
            continue
        rows_per_tile = max(sublane, (tile_bytes // (width * itemsize)) // sublane * sublane)
        rows_per_tile = min(rows_per_tile, rows)
        # Ensure >= 2 grid steps per TensorCore when rows allow (v7x: >=4
        # total) so prologue/epilogue DMA is hidden behind steady-state.
        min_steps = 2 * cores
        if _cdiv(rows, rows_per_tile) < min_steps and rows > sublane:
            steps = min(min_steps, rows // sublane)
            rows_per_tile = _cdiv(_cdiv(rows, steps), sublane) * sublane
        return rows, width, rows_per_tile, vmem_limit

    # numel divisible by 128 but rows never sublane-aligned: only legal as a
    # single full-array block, so require it to comfortably fit VMEM.
    for width in (1024, 512, 256, 128):
        if numel % width == 0 and numel * itemsize <= (2 << 20):
            rows = numel // width
            return rows, width, rows, vmem_limit

    return None


# --------------------------------------------------------------------------
# kernels
# --------------------------------------------------------------------------
def _copy_kernel(x_ref, o_ref):
    # Identity pass over the current tile; with the donated+aliased output
    # this is an in-place HBM -> VMEM -> same-HBM pass.
    o_ref[...] = x_ref[...]


def _dma_copy_kernel(x_hbm_ref, o_hbm_ref, sem):
    # Whole-array HBM->HBM DMA: no VMEM staging, no tile-shape constraints.
    cp = pltpu.make_async_copy(x_hbm_ref, o_hbm_ref, sem)
    cp.start()
    cp.wait()


# --------------------------------------------------------------------------
# tiled (128-aligned) materializing path
# --------------------------------------------------------------------------
@partial(jax.jit, static_argnums=(1, 2, 3, 4, 5), donate_argnums=(0,))
def _materialize_tiled(x, out_shape, rows, width, rows_per_tile, vmem_limit):
    itemsize = jnp.dtype(x.dtype).itemsize
    slab = x.reshape(rows, width)
    grid = (_cdiv(rows, rows_per_tile),)

    out_slab = pl.pallas_call(
        _copy_kernel,
        out_shape=jax.ShapeDtypeStruct((rows, width), x.dtype),
        grid_spec=pltpu.PrefetchScalarGridSpec(
            num_scalar_prefetch=0,
            grid=grid,
            in_specs=[pl.BlockSpec((rows_per_tile, width), lambda i: (i, 0))],
            out_specs=pl.BlockSpec((rows_per_tile, width), lambda i: (i, 0)),
        ),
        # x is donated at the jit boundary, so this alias is a real in-place
        # buffer reuse (no hidden protective copy).
        input_output_aliases={0: 0},
        cost_estimate=pl.CostEstimate(
            flops=0,
            transcendentals=0,
            bytes_accessed=2 * rows * width * itemsize,
        ),
        compiler_params=pltpu.CompilerParams(
            dimension_semantics=("parallel",),
            vmem_limit_bytes=vmem_limit,
        ),
    )(slab)
    return out_slab.reshape(out_shape)


# --------------------------------------------------------------------------
# ragged / non-128-aligned materializing path (replaces the jnp.pad fallback)
# --------------------------------------------------------------------------
@partial(jax.jit, static_argnums=(1,))
def _materialize_dma(x, out_shape):
    itemsize = jnp.dtype(x.dtype).itemsize
    y = pl.pallas_call(
        _dma_copy_kernel,
        out_shape=jax.ShapeDtypeStruct(x.shape, x.dtype),
        in_specs=[pl.BlockSpec(memory_space=pl.ANY)],
        out_specs=pl.BlockSpec(memory_space=pl.ANY),
        scratch_shapes=[pltpu.SemaphoreType.DMA],
        cost_estimate=pl.CostEstimate(
            flops=0, transcendentals=0, bytes_accessed=2 * x.size * itemsize),
    )(x)
    return y.reshape(out_shape)


# --------------------------------------------------------------------------
# public API
# --------------------------------------------------------------------------
def pallas_view(x, shape):
    """torch.Tensor.view(shape) equivalent.

    A view on a contiguous tensor is metadata-only, so the default path moves
    zero bytes (no pallas_call).  Use pallas_view_materialize() when an
    explicit data pass is wanted.
    """
    return jnp.reshape(x, _resolve_shape(shape, x.size))


def pallas_view_materialize(x, shape):
    """View with an explicit materializing identity pass in Pallas.

    NOTE: `x` is donated (the Pallas output aliases its buffer); do not reuse
    `x` after this call.
    """
    numel = x.size
    out_shape = _resolve_shape(shape, numel)
    itemsize = jnp.dtype(x.dtype).itemsize

    plan = _plan_slab(numel, itemsize)
    if plan is None:
        # Non-128-aligned / awkward sizes: single whole-array HBM->HBM DMA
        # (no padding pass; output is a fresh buffer, no aliasing here).
        return _materialize_dma(x, out_shape)

    rows, width, rows_per_tile, vmem_limit = plan
    return _materialize_tiled(x, out_shape, rows, width, rows_per_tile, vmem_limit)


if __name__ == "__main__":
    key = jax.random.PRNGKey(0)
    # Small NCHW-style tensor: (2, 4, 16, 16)
    x = jax.random.normal(key, (2, 4, 16, 16), dtype=jnp.float32)
    target_shape = (2, -1)          # View((2, -1)) -> (2, 1024)

    # Reference: .view() on a contiguous tensor == row-major reshape.
    ref = x.reshape(2, -1)

    # 1) Default module-equivalent path: metadata-only (zero HBM traffic).
    y_view = pallas_view(x, target_shape)

    # 2) Explicit materializing pass through the Pallas kernel.  Pass a copy
    #    because the argument is donated (its buffer is reused in place).
    y_mat = pallas_view_materialize(jnp.copy(x), target_shape)
    y_mat = jax.block_until_ready(y_mat)
    y_view = jax.block_until_ready(y_view)

    assert y_view.shape == ref.shape and y_view.dtype == ref.dtype
    assert y_mat.shape == ref.shape and y_mat.dtype == ref.dtype
    assert bool(jnp.array_equal(y_view, ref))
    assert bool(jnp.array_equal(y_mat, ref))

    print("KERNEL_OK")
</pallas_src>

<mosaic_0001>
module attributes {stable_mosaic.version = 11 : i64} {
  func.func @_copy_kernel(%arg0: i32, %arg1: memref<8x256xf32, #tpu.memory_space<vmem>>, %arg2: memref<8x256xf32, #tpu.memory_space<vmem>>) attributes {dimension_semantics = [#tpu.dimension_semantics<parallel>], iteration_bounds = array<i64: 1>, scalar_prefetch = 0 : i64, scratch_operands = 0 : i64, tpu.core_type = #tpu.core_type<tc>, window_params = [{transform_indices = @transform_0, window_bounds = array<i64: 8, 256>}, {transform_indices = @transform_1, window_bounds = array<i64: 8, 256>}]} {
    %c0 = arith.constant 0 : index
    %c0_0 = arith.constant 0 : index
    %0 = vector.load %arg1[%c0, %c0_0] : memref<8x256xf32, #tpu.memory_space<vmem>>, vector<8x256xf32>
    %c0_1 = arith.constant 0 : index
    %c0_2 = arith.constant 0 : index
    %1 = vector.load %arg2[%c0_1, %c0_2] : memref<8x256xf32, #tpu.memory_space<vmem>>, vector<8x256xf32>
    tpu.vector_store %arg2[%c0_1, %c0_2], %0 {strides = array<i32>} : memref<8x256xf32, #tpu.memory_space<vmem>>, vector<8x256xf32>,
    return
  }
  func.func @transform_0(%arg0: i32) -> (i32, i32) {
    %c0_i32 = arith.constant 0 : i32
    %c0_i32_0 = arith.constant 0 : i32
    return %arg0, %c0_i32 : i32, i32
  }
  func.func @transform_1(%arg0: i32) -> (i32, i32) {
    %c0_i32 = arith.constant 0 : i32
    %c0_i32_0 = arith.constant 0 : i32
    return %arg0, %c0_i32 : i32, i32
  }
}

</mosaic_0001>

<bundles_post_ra>
// kernel: _materialize_tiled.1
= control target key start
LH: loop header
LB: loop body
LE: loop exit
PB: predicated region body
PF: predicated region fallthrough
CT: control target
= control target key end

     0   :  { %s38_s0 = inlined_call_operand.vmem [shape: f32[8,256], index: 0, kind: input, shape index: {}, may-alias: {0,1}]   ;;  %s39_s1 = inlined_call_operand.vmem [shape: f32[8,256], index: 1, kind: output, shape index: {}, may-alias: {0,1}]  }
   0x1   :  { %v8_v0 = vld [vmem:[%s38_s0] sm:$0xff]  ;;  %v9_v1 = vld [vmem:[%s38_s0 + $0x8] sm:$0xff] }
   0x2   :  { %10 = vst [vmem:[%s39_s1] sm:$0xff] %v8_v0  ;;  %11 = vst [vmem:[%s39_s1 + $0x8] sm:$0xff] %v9_v1 }

</bundles_post_ra>
